<compile_context>
chip_gen: v7x
topology: tpu7x:2x2x1
jax: 0.10.0
libtpu: 0.0.40
codegen_flags: <defaults>
</compile_context>

<pallas_src>
import functools
import math

import jax
import jax.numpy as jnp
from jax.experimental import pallas as pl
from jax.experimental.pallas import tpu as pltpu


def _round_up(x, m):
    return ((x + m - 1) // m) * m


def _vcdn_kernel(num_view, x_ref, *refs):
    # refs = R_1, T_1, ..., R_{V-1}, T_{V-1}, W1(bf16), b1(f32), W2(bf16), b2(f32), out
    n_masks = 2 * (num_view - 1)
    mask_refs = refs[:n_masks]
    w1_ref, b1_ref, w2_ref, b2_ref, out_ref = refs[n_masks:]

    # Per-view sigmoid in f32 (EUP/VPU; v5e has no bf16 elementwise path).
    s = [jax.nn.sigmoid(x_ref[v].astype(jnp.float32)) for v in range(num_view)]

    # Iterated outer product, flattened:
    #   feat_new[b, i*C + j] = feat[b, i] * s_v[b, j]
    # realised as (feat @ R) * (s_v @ T) with 0/1 masks that stay resident in
    # VMEM across all batch blocks (constant index maps) -> no per-step mask
    # rebuild. Expansion kept in f32 so no bf16 error compounds across levels.
    feat = s[0]
    for v in range(1, num_view):
        R = mask_refs[2 * (v - 1)][...]          # (m, m*C)   repeat feat elems C times
        T = mask_refs[2 * (v - 1) + 1][...]      # (C, m*C)   tile the view vector m times
        rep = jnp.dot(feat, R, preferred_element_type=jnp.float32)
        til = jnp.dot(s[v], T, preferred_element_type=jnp.float32)
        feat = rep * til                         # (TB, m*C), f32

    # MLP head: Linear -> LeakyReLU(0.25) -> Linear (bf16 MXU operands, f32 acc;
    # bias adds broadcast once per block).
    h = (jnp.dot(feat.astype(jnp.bfloat16), w1_ref[...],
                 preferred_element_type=jnp.float32) + b1_ref[...])
    h = jnp.where(h >= 0.0, h, 0.25 * h)
    out_ref[...] = (jnp.dot(h.astype(jnp.bfloat16), w2_ref[...],
                            preferred_element_type=jnp.float32) + b2_ref[...])


def _make_expansion_masks(num_view, num_cls):
    """Host-side 0/1 masks for each expansion level (exactly representable in f32)."""
    masks = []
    m = num_cls
    for _ in range(1, num_view):
        mc = m * num_cls
        k = jnp.arange(mc)
        masks.append((k[None, :] // num_cls == jnp.arange(m)[:, None]).astype(jnp.float32))
        masks.append((k[None, :] % num_cls == jnp.arange(num_cls)[:, None]).astype(jnp.float32))
        m = mc
    return masks


def vcdn_forward(in_list, w1_t, b1, w2_t, b2, *, tile_b=None):
    """in_list: V tensors (B, C). w1_t: (C**V, H). b1: (H,). w2_t: (H, C). b2: (C,)."""
    num_view = len(in_list)
    B, C = in_list[0].shape
    H = w1_t.shape[1]

    # Batch tile: as large as practical (per-step fixed cost ~0.35 us dominates
    # at small tiles), a multiple of 8 sublanes, capped at ~ceil(B/2) so there
    # are >= 2 grid blocks for v7x dual-TensorCore sharding. Live intermediates
    # are ~1 KB/row, so even tile_b=1024 double-buffered is a few MB of VMEM.
    if tile_b is None:
        if B < 16:
            tile_b = _round_up(B, 8)
        else:
            tile_b = min(1024, _round_up((B + 1) // 2, 8))
    n_blk = pl.cdiv(B, tile_b)
    b_pad = n_blk * tile_b

    # One stacked (V, B, C) input -> a single DMA stream per grid step.
    x = jnp.stack(in_list, axis=0)
    if b_pad != B:
        x = jnp.pad(x, ((0, 0), (0, b_pad - B), (0, 0)))

    # Expansion masks: precomputed once, resident across all batch blocks.
    masks = _make_expansion_masks(num_view, C)

    # Weights bf16 (MXU-native), biases f32 shaped (1, n) for broadcast adds.
    w1_bf = w1_t.astype(jnp.bfloat16)
    w2_bf = w2_t.astype(jnp.bfloat16)
    b1_2d = b1.reshape(1, -1).astype(jnp.float32)
    b2_2d = b2.reshape(1, -1).astype(jnp.float32)

    kernel = functools.partial(_vcdn_kernel, num_view)

    const2d = lambda b: (0, 0)     # weights / biases / masks resident across batch steps
    in_specs = ([pl.BlockSpec((num_view, tile_b, C), lambda b: (0, b, 0))]
                + [pl.BlockSpec(m.shape, const2d) for m in masks]
                + [pl.BlockSpec(w1_bf.shape, const2d),
                   pl.BlockSpec(b1_2d.shape, const2d),
                   pl.BlockSpec(w2_bf.shape, const2d),
                   pl.BlockSpec(b2_2d.shape, const2d)])

    out = pl.pallas_call(
        kernel,
        out_shape=jax.ShapeDtypeStruct((b_pad, C), jnp.float32),
        grid=(n_blk,),
        in_specs=in_specs,
        out_specs=pl.BlockSpec((tile_b, C), lambda b: (b, 0)),
        compiler_params=pltpu.CompilerParams(
            dimension_semantics=("parallel",)),   # shard batch blocks across TCs on v7x
    )(x, *masks, w1_bf, b1_2d, w2_bf, b2_2d)

    return out[:B]


def vcdn_reference(in_list, w1_t, b1, w2_t, b2):
    """Pure-JAX (f32) re-statement of the PyTorch forward, for verification."""
    s = [jax.nn.sigmoid(x) for x in in_list]
    B, C = s[0].shape
    feat = s[0]
    for i in range(1, len(s)):
        feat = (feat[:, :, None] * s[i][:, None, :]).reshape(B, -1)
    h = feat @ w1_t + b1
    h = jnp.where(h >= 0.0, h, 0.25 * h)
    return h @ w2_t + b2


def make_params(key, num_view, num_cls, hvcdn_dim):
    """Deterministic xavier_normal weights, zero biases (matches xavier_init)."""
    in1 = num_cls ** num_view
    k1, k2 = jax.random.split(key)
    std1 = math.sqrt(2.0 / (in1 + hvcdn_dim))
    std2 = math.sqrt(2.0 / (hvcdn_dim + num_cls))
    # PyTorch Linear weight is (out, in); store transposed (in, out).
    w1_t = (jax.random.normal(k1, (hvcdn_dim, in1), jnp.float32) * std1).T
    w2_t = (jax.random.normal(k2, (num_cls, hvcdn_dim), jnp.float32) * std2).T
    b1 = jnp.zeros((hvcdn_dim,), jnp.float32)
    b2 = jnp.zeros((num_cls,), jnp.float32)
    return w1_t, b1, w2_t, b2


if __name__ == "__main__":
    num_view, num_cls, hvcdn_dim, batch = 3, 4, 32, 8

    key = jax.random.PRNGKey(0)
    kp, *kx = jax.random.split(key, 1 + num_view)
    in_list = [jax.random.normal(k, (batch, num_cls), jnp.float32) for k in kx]
    w1_t, b1, w2_t, b2 = make_params(kp, num_view, num_cls, hvcdn_dim)

    out = vcdn_forward(in_list, w1_t, b1, w2_t, b2)
    out = jax.block_until_ready(out)

    ref = vcdn_reference(in_list, w1_t, b1, w2_t, b2)
    assert out.shape == (batch, num_cls)
    # Expansion stays in f32; only the MLP matmuls use bf16 MXU operands
    # (f32 accumulation) -> slightly loosened tolerance vs f32 reference.
    assert jnp.allclose(out, ref, atol=3e-2, rtol=3e-2), "mismatch vs reference"

    print("KERNEL_OK")
</pallas_src>

<mosaic_0001>
module attributes {stable_mosaic.version = 11 : i64} {
  func.func @_vcdn_kernel(%arg0: i32, %arg1: memref<3x8x4xf32, #tpu.memory_space<vmem>>, %arg2: memref<4x16xf32, #tpu.memory_space<vmem>>, %arg3: memref<4x16xf32, #tpu.memory_space<vmem>>, %arg4: memref<16x64xf32, #tpu.memory_space<vmem>>, %arg5: memref<4x64xf32, #tpu.memory_space<vmem>>, %arg6: memref<64x32xbf16, #tpu.memory_space<vmem>>, %arg7: memref<1x32xf32, #tpu.memory_space<vmem>>, %arg8: memref<32x4xbf16, #tpu.memory_space<vmem>>, %arg9: memref<1x4xf32, #tpu.memory_space<vmem>>, %arg10: memref<8x4xf32, #tpu.memory_space<vmem>>) attributes {dimension_semantics = [#tpu.dimension_semantics<parallel>], iteration_bounds = array<i64: 1>, scalar_prefetch = 0 : i64, scratch_operands = 0 : i64, tpu.core_type = #tpu.core_type<tc>, window_params = [{transform_indices = @transform_0, window_bounds = array<i64: 3, 8, 4>}, {pipeline_mode = #tpu.pipeline_mode<synchronous>, transform_indices = @transform_1, window_bounds = array<i64: 4, 16>}, {pipeline_mode = #tpu.pipeline_mode<synchronous>, transform_indices = @transform_2, window_bounds = array<i64: 4, 16>}, {pipeline_mode = #tpu.pipeline_mode<synchronous>, transform_indices = @transform_3, window_bounds = array<i64: 16, 64>}, {pipeline_mode = #tpu.pipeline_mode<synchronous>, transform_indices = @transform_4, window_bounds = array<i64: 4, 64>}, {pipeline_mode = #tpu.pipeline_mode<synchronous>, transform_indices = @transform_5, window_bounds = array<i64: 64, 32>}, {pipeline_mode = #tpu.pipeline_mode<synchronous>, transform_indices = @transform_6, window_bounds = array<i64: 1, 32>}, {pipeline_mode = #tpu.pipeline_mode<synchronous>, transform_indices = @transform_7, window_bounds = array<i64: 32, 4>}, {pipeline_mode = #tpu.pipeline_mode<synchronous>, transform_indices = @transform_8, window_bounds = array<i64: 1, 4>}, {transform_indices = @transform_9, window_bounds = array<i64: 8, 4>}]} {
    %c0 = arith.constant 0 : index
    %c0_0 = arith.constant 0 : index
    %c0_1 = arith.constant 0 : index
    %0 = vector.load %arg1[%c0, %c0_0, %c0_1] : memref<3x8x4xf32, #tpu.memory_space<vmem>>, vector<1x8x4xf32>
    %1 = vector.shape_cast %0 : vector<1x8x4xf32> to vector<8x4xf32>
    %2 = arith.negf %1 : vector<8x4xf32>
    %3 = math.exp %2 : vector<8x4xf32>
    %cst = arith.constant 1.000000e+00 : f32
    %4 = vector.broadcast %cst : f32 to vector<8x4xf32>
    %5 = arith.addf %4, %3 : vector<8x4xf32>
    %6 = arith.divf %4, %5 : vector<8x4xf32>
    %c1 = arith.constant 1 : index
    %c0_2 = arith.constant 0 : index
    %c0_3 = arith.constant 0 : index
    %7 = vector.load %arg1[%c1, %c0_2, %c0_3] : memref<3x8x4xf32, #tpu.memory_space<vmem>>, vector<1x8x4xf32>
    %8 = vector.shape_cast %7 : vector<1x8x4xf32> to vector<8x4xf32>
    %9 = arith.negf %8 : vector<8x4xf32>
    %10 = math.exp %9 : vector<8x4xf32>
    %cst_4 = arith.constant 1.000000e+00 : f32
    %11 = vector.broadcast %cst_4 : f32 to vector<8x4xf32>
    %12 = arith.addf %11, %10 : vector<8x4xf32>
    %13 = arith.divf %11, %12 : vector<8x4xf32>
    %c2 = arith.constant 2 : index
    %c0_5 = arith.constant 0 : index
    %c0_6 = arith.constant 0 : index
    %14 = vector.load %arg1[%c2, %c0_5, %c0_6] : memref<3x8x4xf32, #tpu.memory_space<vmem>>, vector<1x8x4xf32>
    %15 = vector.shape_cast %14 : vector<1x8x4xf32> to vector<8x4xf32>
    %16 = arith.negf %15 : vector<8x4xf32>
    %17 = math.exp %16 : vector<8x4xf32>
    %cst_7 = arith.constant 1.000000e+00 : f32
    %18 = vector.broadcast %cst_7 : f32 to vector<8x4xf32>
    %19 = arith.addf %18, %17 : vector<8x4xf32>
    %20 = arith.divf %18, %19 : vector<8x4xf32>
    %c0_8 = arith.constant 0 : index
    %c0_9 = arith.constant 0 : index
    %21 = vector.load %arg2[%c0_8, %c0_9] : memref<4x16xf32, #tpu.memory_space<vmem>>, vector<4x16xf32>
    %c0_10 = arith.constant 0 : index
    %c0_11 = arith.constant 0 : index
    %22 = vector.load %arg3[%c0_10, %c0_11] : memref<4x16xf32, #tpu.memory_space<vmem>>, vector<4x16xf32>
    %cst_12 = arith.constant dense<0.000000e+00> : vector<8x16xf32>
    %23 = tpu.matmul %6, %21, %cst_12 {dimension_numbers = #tpu.dot_dimension_numbers<[1], [0], [0], [1], [0, 0, 1, 1], [], []>} : vector<8x4xf32>, vector<4x16xf32>, vector<8x16xf32> -> vector<8x16xf32>
    %cst_13 = arith.constant dense<0.000000e+00> : vector<8x16xf32>
    %24 = tpu.matmul %13, %22, %cst_13 {dimension_numbers = #tpu.dot_dimension_numbers<[1], [0], [0], [1], [0, 0, 1, 1], [], []>} : vector<8x4xf32>, vector<4x16xf32>, vector<8x16xf32> -> vector<8x16xf32>
    %25 = arith.mulf %23, %24 : vector<8x16xf32>
    %c0_14 = arith.constant 0 : index
    %c0_15 = arith.constant 0 : index
    %26 = vector.load %arg4[%c0_14, %c0_15] : memref<16x64xf32, #tpu.memory_space<vmem>>, vector<16x64xf32>
    %c0_16 = arith.constant 0 : index
    %c0_17 = arith.constant 0 : index
    %27 = vector.load %arg5[%c0_16, %c0_17] : memref<4x64xf32, #tpu.memory_space<vmem>>, vector<4x64xf32>
    %cst_18 = arith.constant dense<0.000000e+00> : vector<8x64xf32>
    %28 = tpu.matmul %25, %26, %cst_18 {dimension_numbers = #tpu.dot_dimension_numbers<[1], [0], [0], [1], [0, 0, 1, 1], [], []>} : vector<8x16xf32>, vector<16x64xf32>, vector<8x64xf32> -> vector<8x64xf32>
    %cst_19 = arith.constant dense<0.000000e+00> : vector<8x64xf32>
    %29 = tpu.matmul %20, %27, %cst_19 {dimension_numbers = #tpu.dot_dimension_numbers<[1], [0], [0], [1], [0, 0, 1, 1], [], []>} : vector<8x4xf32>, vector<4x64xf32>, vector<8x64xf32> -> vector<8x64xf32>
    %30 = arith.mulf %28, %29 : vector<8x64xf32>
    %31 = arith.truncf %30 : vector<8x64xf32> to vector<8x64xbf16>
    %c0_20 = arith.constant 0 : index
    %c0_21 = arith.constant 0 : index
    %32 = vector.load %arg6[%c0_20, %c0_21] : memref<64x32xbf16, #tpu.memory_space<vmem>>, vector<64x32xbf16>
    %cst_22 = arith.constant dense<0.000000e+00> : vector<8x32xf32>
    %33 = tpu.matmul %31, %32, %cst_22 {dimension_numbers = #tpu.dot_dimension_numbers<[1], [0], [0], [1], [0, 0, 1, 1], [], []>} : vector<8x64xbf16>, vector<64x32xbf16>, vector<8x32xf32> -> vector<8x32xf32>
    %c0_23 = arith.constant 0 : index
    %c0_24 = arith.constant 0 : index
    %34 = vector.load %arg7[%c0_23, %c0_24] : memref<1x32xf32, #tpu.memory_space<vmem>>, vector<1x32xf32>
    %35 = vector.broadcast %34 : vector<1x32xf32> to vector<8x32xf32>
    %36 = arith.addf %33, %35 : vector<8x32xf32>
    %cst_25 = arith.constant 0.000000e+00 : f32
    %37 = vector.broadcast %cst_25 : f32 to vector<8x32xf32>
    %38 = arith.cmpf oge, %36, %37 : vector<8x32xf32>
    %cst_26 = arith.constant 2.500000e-01 : f32
    %39 = vector.broadcast %cst_26 : f32 to vector<8x32xf32>
    %40 = arith.mulf %39, %36 : vector<8x32xf32>
    %41 = arith.select %38, %36, %40 : vector<8x32xi1>, vector<8x32xf32>
    %42 = arith.truncf %41 : vector<8x32xf32> to vector<8x32xbf16>
    %c0_27 = arith.constant 0 : index
    %c0_28 = arith.constant 0 : index
    %43 = vector.load %arg8[%c0_27, %c0_28] : memref<32x4xbf16, #tpu.memory_space<vmem>>, vector<32x4xbf16>
    %cst_29 = arith.constant dense<0.000000e+00> : vector<8x4xf32>
    %44 = tpu.matmul %42, %43, %cst_29 {dimension_numbers = #tpu.dot_dimension_numbers<[1], [0], [0], [1], [0, 0, 1, 1], [], []>} : vector<8x32xbf16>, vector<32x4xbf16>, vector<8x4xf32> -> vector<8x4xf32>
    %c0_30 = arith.constant 0 : index
    %c0_31 = arith.constant 0 : index
    %45 = vector.load %arg9[%c0_30, %c0_31] : memref<1x4xf32, #tpu.memory_space<vmem>>, vector<1x4xf32>
    %46 = vector.broadcast %45 : vector<1x4xf32> to vector<8x4xf32>
    %47 = arith.addf %44, %46 : vector<8x4xf32>
    %c0_32 = arith.constant 0 : index
    %c0_33 = arith.constant 0 : index
    %48 = vector.load %arg10[%c0_32, %c0_33] : memref<8x4xf32, #tpu.memory_space<vmem>>, vector<8x4xf32>
    tpu.vector_store %arg10[%c0_32, %c0_33], %47 {strides = array<i32>} : memref<8x4xf32, #tpu.memory_space<vmem>>, vector<8x4xf32>,
    return
  }
  func.func @transform_0(%arg0: i32) -> (i32, i32, i32) {
    %c0_i32 = arith.constant 0 : i32
    %c0_i32_0 = arith.constant 0 : i32
    %c0_i32_1 = arith.constant 0 : i32
    return %c0_i32, %arg0, %c0_i32_0 : i32, i32, i32
  }
  func.func @transform_1(%arg0: i32) -> (i32, i32) {
    %c0_i32 = arith.constant 0 : i32
    %c0_i32_0 = arith.constant 0 : i32
    %c0_i32_1 = arith.constant 0 : i32
    return %c0_i32, %c0_i32_0 : i32, i32
  }
  func.func @transform_2(%arg0: i32) -> (i32, i32) {
    %c0_i32 = arith.constant 0 : i32
    %c0_i32_0 = arith.constant 0 : i32
    %c0_i32_1 = arith.constant 0 : i32
    return %c0_i32, %c0_i32_0 : i32, i32
  }
  func.func @transform_3(%arg0: i32) -> (i32, i32) {
    %c0_i32 = arith.constant 0 : i32
    %c0_i32_0 = arith.constant 0 : i32
    %c0_i32_1 = arith.constant 0 : i32
    return %c0_i32, %c0_i32_0 : i32, i32
  }
  func.func @transform_4(%arg0: i32) -> (i32, i32) {
    %c0_i32 = arith.constant 0 : i32
    %c0_i32_0 = arith.constant 0 : i32
    %c0_i32_1 = arith.constant 0 : i32
    return %c0_i32, %c0_i32_0 : i32, i32
  }
  func.func @transform_5(%arg0: i32) -> (i32, i32) {
    %c0_i32 = arith.constant 0 : i32
    %c0_i32_0 = arith.constant 0 : i32
    %c0_i32_1 = arith.constant 0 : i32
    return %c0_i32, %c0_i32_0 : i32, i32
  }
  func.func @transform_6(%arg0: i32) -> (i32, i32) {
    %c0_i32 = arith.constant 0 : i32
    %c0_i32_0 = arith.constant 0 : i32
    %c0_i32_1 = arith.constant 0 : i32
    return %c0_i32, %c0_i32_0 : i32, i32
  }
  func.func @transform_7(%arg0: i32) -> (i32, i32) {
    %c0_i32 = arith.constant 0 : i32
    %c0_i32_0 = arith.constant 0 : i32
    %c0_i32_1 = arith.constant 0 : i32
    return %c0_i32, %c0_i32_0 : i32, i32
  }
  func.func @transform_8(%arg0: i32) -> (i32, i32) {
    %c0_i32 = arith.constant 0 : i32
    %c0_i32_0 = arith.constant 0 : i32
    %c0_i32_1 = arith.constant 0 : i32
    return %c0_i32, %c0_i32_0 : i32, i32
  }
  func.func @transform_9(%arg0: i32) -> (i32, i32) {
    %c0_i32 = arith.constant 0 : i32
    %c0_i32_0 = arith.constant 0 : i32
    return %arg0, %c0_i32 : i32, i32
  }
}

</mosaic_0001>

<bundles_post_ra>
// kernel: tpu_custom_call.1
= control target key start
LH: loop header
LB: loop body
LE: loop exit
PB: predicated region body
PF: predicated region fallthrough
CT: control target
= control target key end

     0   :  { %vm62_vm0 = vcmask 1043456   ;;  %v632_v0 = vmov 0.0   ;;  %vm633_vm1 = vmmov 0   ;;  %v634_v7 = vmov 0.0|0.0   ;;  %s764_s1 = inlined_call_operand.vmem [shape: f32[4,16], index: 1, kind: input, shape index: {}]   ;;  %s765_s2 = inlined_call_operand.vmem [shape: f32[4,16], index: 2, kind: input, shape index: {}]   ;;  %s766_s0 = inlined_call_operand.vmem [shape: f32[3,8,4], index: 0, kind: input, shape index: {}]   ;;  %s767_s3 = inlined_call_operand.vmem [shape: f32[16,64], index: 3, kind: input, shape index: {}]   ;;  %s768_s5 = inlined_call_operand.vmem [shape: bf16[64,32], index: 5, kind: input, shape index: {}]   ;;  %s769_s4 = inlined_call_operand.vmem [shape: f32[4,64], index: 4, kind: input, shape index: {}]   ;;  %s770_s7 = inlined_call_operand.vmem [shape: bf16[32,4], index: 7, kind: input, shape index: {}]   ;;  %s771_s6 = inlined_call_operand.vmem [shape: f32[1,32], index: 6, kind: input, shape index: {}]   ;;  %s772_s8 = inlined_call_operand.vmem [shape: f32[1,4], index: 8, kind: input, shape index: {}]   ;;  %s773_s9 = inlined_call_operand.vmem [shape: f32[8,4], index: 9, kind: output, shape index: {}]  }
   0x1   :  { %566 = vmatprep.subr.mxu0 %v632_v0  ;;  %571 = vmatprep.subr.mxu1 %v632_v0  ;;  %v56_v1 = vld [vmem:[%s764_s1] sm:$0xf]  ;;  %v528_v5 = vld [vmem:[%s766_s0 + $0x8] sm:$0xff]  ;;  %vm58_vm2 = vcmask 31744   ;;  %v530_v19 = vld [vmem:[%s766_s0 + $0x10] sm:$0xff]  ;;  %vm216_vm3 = vcmask 130048  }
   0x2   :  { %v57_v2 = vld [vmem:[%s765_s2] sm:$0xf]  ;;  %567 = vmatpush3.msk.msra.mxu0 %vm62_vm0, %v56_v1  ;;  %568 = vmatprep.mubr.msk.f32.mxu0 %vm633_vm1, %v632_v0  ;;  %v529_v6 = vmul.f32 -1.442695, %v528_v5  ;;  %v214_v13 = vld [vmem:[%s767_s3 + $0x8] sm:$0xff]  ;;  %v616_v30 = vld [vmem:[%s768_s5 + $0x10] sm:$0xff]  }
   0x3   :  { %v33_v3 = vld [vmem:[%s766_s0] sm:$0xff]  ;;  %572 = vmatpush3.msk.msra.mxu1 %vm62_vm0, %v57_v2  ;;  %573 = vmatprep.mubr.msk.f32.mxu1 %vm633_vm1, %v632_v0  ;;  %v615_v18 = vld [vmem:[%s768_s5 + $0x8] sm:$0xff]   ;;  %v531_v20 = vmul.f32 -1.442695, %v530_v19  ;;  %v617_v31 = vld [vmem:[%s768_s5 + $0x18] sm:$0xff]   ;;  %vm407_vm4 = vcmask 523264  }
   0x4   :  { %v527_v4 = vmul.f32 -1.442695, %v33_v3  ;;  %608 = vmatprep.subr.bf16.mxu1 %v634_v7  ;;  %588 = vmatprep.subr.bf16.mxu0 %v632_v0  ;;  %v213_v12 = vld [vmem:[%s767_s3] sm:$0xff]  ;;  %v619_v39 = vld [vmem:[%s770_s7 + $0x8] sm:$0xff]   ;;  %vm478_vm6 = vcmask 261120  }
   0x5   :  { %v609_v15 = vpack.c.bf16 %v214_v13, %v213_v12  ;;  %v614_v17 = vld [vmem:[%s768_s5] sm:$0xff]  }
   0x6   :  { %620 = vpow2.f32 %v527_v4  ;;  %v215_v28 = vld [vmem:[%s769_s4] sm:$0xf] }
   0x7   :  { %622 = vpow2.f32 %v529_v6  ;;  %v618_v38 = vld [vmem:[%s770_s7] sm:$0xff]  }
   0x8   :  { %v539_v40 = vld [vmem:[%s771_s6] ss:$0 sm:$0xff] }
   0x9   :  { %v545_v49 = vld [vmem:[%s772_s8] ss:$0 sm:$0xff] }
  0x10   :  { %v621_v8 = vpop.eup %620 }
  0x11   :  { %v37_v9 = vadd.f32 1.0, %v621_v8  ;;  %v623_v10 = vpop.eup %622 }
  0x12   :  { %v45_v11 = vadd.f32 1.0, %v623_v10 }
  0x13   :  { %624 = vrcp.f32 %v37_v9 }
  0x14   :  { %626 = vrcp.f32 %v45_v11 }
  0x15   :  { %628 = vpow2.f32 %v531_v20 }
  0x1d   :  { %v625_v14 = vpop.eup %624 }
  0x1e   :  { %569 = vmatmul.mubr.msk.f32.vlgmr.msra.gmra.mrb[0].mxu0 %vm58_vm2, %v625_v14  ;;  %v627_v16 = vpop.eup %626 }
  0x1f   :  { %596 = vmatprep.mubr.msk.bf16.mxu0 %vm633_vm1, %v632_v0  ;;  %574 = vmatmul.mubr.msk.f32.vlgmr.msra.gmra.mrb[0].mxu1 %vm58_vm2, %v627_v16  ;;  %v629_v21 = vpop.eup %628 }
  0x20   :  { %610 = vmatpush3.bf16.msra.mxu1 %v609_v15  ;;  %580 = vmatprep.mubr.msk.f32.mxu1 %vm633_vm1, %v632_v0  ;;  %v53_v22 = vadd.f32 1.0, %v629_v21 }
  0x21   :  { %583 = vmatprep.subr.mxu1 %v632_v0  ;;  %589 = vmatpush3.bf16.msra.mxu0 %v614_v17 }
  0x22   :  { %590 = vmatprep.subr.bf16.mxu0 %v632_v0  ;;  %630 = vrcp.f32 %v53_v22 }
  0x25   :  { %591 = vmatpush3.bf16.msra.mxu0 %v615_v18 }
  0x26   :  { %592 = vmatprep.subr.bf16.mxu0 %v632_v0 }
  0x29   :  { %593 = vmatpush3.bf16.msra.mxu0 %v616_v30 }
  0x2a   :  { %594 = vmatprep.subr.bf16.mxu0 %v632_v0 }
  0x2c   :  { %v631_v29 = vpop.eup %630 }
  0x2d   :  { %595 = vmatpush3.bf16.msra.mxu0 %v617_v31 }
  0xf1   :  { %v132_v23 = vpop.f32.mrb[0].mxu0 }
  0xf2   :  { %v570_v24 = vpop.f32.mrb[1].mxu0  ;;  %v208_v25 = vpop.f32.mrb[0].mxu1 }
  0xf3   :  { %v212_v26 = vmul.f32 %v208_v25, %v132_v23  ;;  %v575_v27 = vpop.f32.mrb[1].mxu1 }
  0xf5   :  { %581 = vmatmul.mubr.msk.f32.vlgmr.msra.gmra.mrb[2].mxu1 %vm216_vm3, %v212_v26 }
  0xf6   :  { %584 = vmatpush3.msk.msra.mxu1 %vm62_vm0, %v215_v28  ;;  %585 = vmatprep.mubr.msk.f32.mxu1 %vm633_vm1, %v632_v0 }
  0xf7   :  { %600 = vmatprep.subr.bf16.mxu1 %v632_v0 }
  0xf9   :  { %586 = vmatmul.mubr.msk.f32.vlgmr.msra.gmra.mrb[4].mxu1 %vm58_vm2, %v631_v29 }
  0xfa   :  { %604 = vmatprep.mubr.msk.bf16.mxu1 %vm633_vm1, %v632_v0  ;;  %601 = vmatpush3.bf16.msra.mxu1 %v618_v38 }
  0xfb   :  { %602 = vmatprep.subr.bf16.mxu1 %v632_v0 }
  0xfe   :  { %603 = vmatpush3.bf16.msra.mxu1 %v619_v39 }
 0x1c8   :  { %v286_v32 = vpop.f32.mrb[2].mxu1 }
 0x1c9   :  { %v582_v33 = vpop.f32.mrb[3].mxu1 }
 0x1cc   :  { %v362_v34 = vpop.f32.mrb[4].mxu1 }
 0x1cd   :  { %v366_v35 = vmul.f32 %v362_v34, %v286_v32  ;;  %v587_v36 = vpop.f32.mrb[5].mxu1 }
 0x1cf   :  { %v367_v37 = vpack.c.bf16 %v366_v35, %v366_v35 }
 0x1d1   :  { %597 = vmatmul.mubr.msk.bf16.vlgmr.msra.gmra.mrb[4].mxu0 %vm407_vm4, %v367_v37 }
 0x2a4   :  { %v445_v41 = vpop.f32.mrb[4].mxu0 }
 0x2a5   :  { %v446_v42 = vadd.f32 %v539_v40, %v445_v41  ;;  %v598_v43 = vpop.f32.mrb[5].mxu0 }
 0x2a6   :  { %v448_v44 = vpop.f32.mrb[6].mxu0 }
 0x2a7   :  { %vm451_vm5 = vcmp.ge.f32.partialorder %v446_v42, 0.0  ;;  %v452_v45 = vmul.f32 0.25, %v446_v42  ;;  %v599_v46 = vpop.f32.mrb[7].mxu0 }
 0x2a9   :  { %v453_v47 = vsel %vm451_vm5, %v446_v42, %v452_v45 }
 0x2aa   :  { %v454_v48 = vpack.c.bf16 %v453_v47, %v453_v47 }
 0x2ac   :  { %605 = vmatmul.mubr.msk.bf16.vlgmr.msra.gmra.mrb[8].mxu1 %vm478_vm6, %v454_v48 }
 0x37f   :  { %v516_v50 = vpop.f32.mrb[8].mxu1 }
 0x380   :  { %v517_v51 = vadd.f32 %v545_v49, %v516_v50  ;;  %v606_v52 = vpop.f32.mrb[9].mxu1 }
 0x381   :  { %v519_v53 = vpop.f32.mrb[10].mxu1 }
 0x382   :  { %522 = vst.msk [vmem:[%s773_s9] sm:$0xff] %vm58_vm2, %v517_v51  ;;  %v607_v54 = vpop.f32.mrb[11].mxu1 }

</bundles_post_ra>
